<compile_context>
chip_gen: v5e
topology: v5e:2x2
jax: 0.10.0
libtpu: 0.0.40
codegen_flags: <defaults>
</compile_context>

<pallas_src>
import jax
import jax.numpy as jnp
from jax.experimental import pallas as pl
from jax.experimental.pallas import tpu as pltpu


def _make_kernel(lc_real, bf16_exp):
    def bi_attention_kernel(c_ref, q_ref, mb_ref, wcol_ref, wrow_ref, g_ref):
        c = c_ref[...]            # (Bt, Lc, D)  f32
        q = q_ref[...]            # (Bt, Lq, D)  f32
        mask_bias = mb_ref[...]   # (Bt, 1, Lq)  f32 == att_b - 1e30*(1 - mask)
        w_cols = wcol_ref[...]    # (D, 8)   cols = [w_c, w_q, w_cq, w_i, w_m, 0, 0, 0]
        wq_row = wrow_ref[1:2, :]   # (1, D)  att weight slice for question
        wcq_row = wrow_ref[2:3, :]  # (1, D)  att weight slice for context*question

        Bt, Lc, D = c.shape
        Lq = q.shape[1]

        # --- Thin projections on the MXU (f32 acc); batch merged into the row dim so the
        #     MXU sees one full-size operand.  Outputs are naturally Lc/Lq-sublane-major.
        cw = jnp.dot(c.reshape(Bt * Lc, D), w_cols,
                     preferred_element_type=jnp.float32).reshape(Bt, Lc, 8)
        qw = jnp.dot(q.reshape(Bt * Lq, D), w_cols,
                     preferred_element_type=jnp.float32).reshape(Bt, Lq, 8)
        s_c = cw[:, :, 0:1]        # (Bt, Lc, 1)  att context term
        c_lin = cw[:, :, 3:4]      # (Bt, Lc, 1)  input_linear(context)
        q_lin = qw[:, :, 4:5]      # (Bt, Lq, 1)  memory_linear(question)

        # s_q is consumed lane-major (per-question-column row bias); a VPU lane reduce over
        # the small question operand delivers that layout directly (no relayout needed).
        s_q = jnp.sum(q * wq_row, axis=-1)                        # (Bt, Lq)

        # --- The one real score matmul: c_i . (q_j * w_cq), bf16 operands, f32 accumulate.
        s_cq = jnp.einsum(
            "bld,bmd->blm",
            c.astype(jnp.bfloat16),
            (q * wcq_row).astype(jnp.bfloat16),
            preferred_element_type=jnp.float32)                   # (Bt, Lc, Lq)

        masked = s_cq + s_c + (s_q[:, None, :] + mask_bias)       # (Bt, Lc, Lq)  f32

        # --- Softmax over question positions.
        row_max = jnp.max(masked, axis=-1, keepdims=True)         # (Bt, Lc, 1)
        delta = masked - row_max
        if bf16_exp:    # v6e/v7x: bf16 EUP exp; e feeds a bf16 MXU reduce anyway
            e = jnp.exp(delta.astype(jnp.bfloat16))
        else:           # v5e and older: no bf16 EUP/VPU
            e = jnp.exp(delta).astype(jnp.bfloat16)

        # rowsum and sum_j e_ij * q_lin_j fused into one MXU matmul against [q_lin, 1].
        red = jnp.concatenate([q_lin, jnp.ones_like(q_lin)], axis=-1)      # (Bt, Lq, 2)
        nr = jnp.einsum("blm,bmn->bln", e, red.astype(jnp.bfloat16),
                        preferred_element_type=jnp.float32)                # (Bt, Lc, 2)
        num = nr[:, :, 0:1]
        den = nr[:, :, 1:2]
        U = num * pl.reciprocal(den, approx=True)                          # (Bt, Lc, 1)

        # --- u_aware softmax over the context axis of row_max, reduced straight into H.
        rm = row_max                                              # reuse; no second max pass
        if lc_real != Lc:  # padded context rows must not enter the column softmax
            rows = jax.lax.broadcasted_iota(jnp.int32, (1, Lc, 1), 1)
            rm = jnp.where(rows < lc_real, rm, -1e30)
        col_max = jnp.max(rm, axis=1, keepdims=True)              # (Bt, 1, 1)
        em = jnp.exp(rm - col_max)                                # (Bt, Lc, 1)  f32 (tiny)
        H = (jnp.sum(em * c_lin, axis=1, keepdims=True)
             * pl.reciprocal(jnp.sum(em, axis=1, keepdims=True), approx=True))  # (Bt, 1, 1)

        # --- Single full-block store: G = [context_lin, U, context_lin*U, U*H].
        g_ref[...] = jnp.concatenate([c_lin, U, c_lin * U, U * H], axis=-1)

    return bi_attention_kernel


def _round_up(x, m):
    return ((x + m - 1) // m) * m


def _vmem_capacity_bytes():
    try:
        return int(pltpu.get_tpu_info().vmem_capacity_bytes)
    except Exception:
        return 64 << 20   # conservative fallback (v7x per-core VMEM)


def _supports_bf16_eup():
    try:
        kind = jax.devices()[0].device_kind.lower()
    except Exception:
        return False
    # v6e / v7x have bf16 VPU/EUP; v2-v5 do not (bf16 exp would only lose precision there).
    return not any(tag in kind for tag in ("v2", "v3", "v4", "v5"))


def _choose_bt(B, Lc, Lq, D, budget_bytes):
    """Largest divisor of B whose per-grid-step working set fits the VMEM budget,
    capped so the grid keeps >= 2 'parallel' steps (both v7x TensorCores get work)."""
    stream = 4 * (Lc * D + Lq * D + Lq + 4 * Lc)      # per-batch streamed in/out bytes (f32)
    temps = (4 * 2 * Lc * Lq                          # s_cq + masked (f32)
             + 2 * Lc * Lq                            # e (bf16)
             + 2 * (Lc + Lq) * D                      # bf16 operand copies for the score matmul
             + 4 * Lq * D                             # q * w_cq (f32)
             + 4 * 8 * (Lc + Lq)                      # thin-projection results
             + 4 * 16 * Lc)                           # row_max / U / num / den / output staging
    per_b = 2 * stream + temps                        # 2x: double-buffered pipelining
    bt = max(1, min(B, budget_bytes // max(per_b, 1)))
    if B >= 2:
        bt = min(bt, max(1, B // 2))
    while B % bt:
        bt -= 1
    return bt


def bi_attention_forward(context, question, mask, params):
    B, Lc, D = context.shape
    Lq = question.shape[1]

    att_w = params["att_w"].astype(jnp.float32)        # (1, 3*D) == nn.Linear(hidden*6, 1).weight
    att_b = params["att_b"].astype(jnp.float32)        # (1,)
    wi = params["wi"].astype(jnp.float32)               # (1, D)  input_linear.weight  (no bias)
    wm = params["wm"].astype(jnp.float32)               # (1, D)  memory_linear.weight (no bias)

    context = context.astype(jnp.float32)
    question = question.astype(jnp.float32)
    mask = mask.astype(jnp.float32)

    # Pad Lq to a lane multiple (padded positions get mask=0 -> -1e30 penalty) and Lc to a
    # bf16 sublane-pack multiple (padded rows are zero and are masked out of the H softmax).
    Lq_p = _round_up(Lq, 128)
    Lc_p = _round_up(Lc, 16)
    if Lq_p != Lq:
        question = jnp.pad(question, ((0, 0), (0, Lq_p - Lq), (0, 0)))
        mask = jnp.pad(mask, ((0, 0), (0, Lq_p - Lq)))
    if Lc_p != Lc:
        context = jnp.pad(context, ((0, 0), (0, Lc_p - Lc), (0, 0)))

    # Fold att bias + mask penalty into one per-question-position row bias.
    mask_bias = (att_b[0] - 1e30 * (1.0 - mask)).reshape(B, 1, Lq_p)

    # Pack the five thin weight rows into one sublane-aligned (8, D) block; the transposed
    # (D, 8) copy feeds the MXU thin-projection matmul (both are tiny constant blocks).
    w_rows = jnp.zeros((8, D), jnp.float32)
    w_rows = w_rows.at[0].set(att_w[0, 0:D])           # w_c
    w_rows = w_rows.at[1].set(att_w[0, D:2 * D])       # w_q
    w_rows = w_rows.at[2].set(att_w[0, 2 * D:3 * D])   # w_cq
    w_rows = w_rows.at[3].set(wi[0])                   # input_linear
    w_rows = w_rows.at[4].set(wm[0])                   # memory_linear
    w_cols = jnp.transpose(w_rows)                     # (D, 8)

    vmem_cap = _vmem_capacity_bytes()
    vmem_limit = int(vmem_cap * 3 // 4)                # leave headroom for compiler scratch
    Bt = _choose_bt(B, Lc_p, Lq_p, D, budget_bytes=vmem_cap // 2)
    grid = (B // Bt,)

    kernel = _make_kernel(lc_real=Lc, bf16_exp=_supports_bf16_eup())

    grid_spec = pltpu.PrefetchScalarGridSpec(
        num_scalar_prefetch=0,
        grid=grid,
        in_specs=[
            pl.BlockSpec((Bt, Lc_p, D), lambda b: (b, 0, 0)),    # context (maybe row-padded)
            pl.BlockSpec((Bt, Lq_p, D), lambda b: (b, 0, 0)),    # question (maybe row-padded)
            pl.BlockSpec((Bt, 1, Lq_p), lambda b: (b, 0, 0)),    # att_b - 1e30*(1-mask)
            pl.BlockSpec((D, 8), lambda b: (0, 0)),              # packed thin weights (cols)
            pl.BlockSpec((8, D), lambda b: (0, 0)),              # packed thin weights (rows)
        ],
        out_specs=pl.BlockSpec((Bt, Lc_p, 4), lambda b: (b, 0, 0)),
    )

    out = pl.pallas_call(
        kernel,
        out_shape=jax.ShapeDtypeStruct((B, Lc_p, 4), jnp.float32),
        grid_spec=grid_spec,
        compiler_params=pltpu.CompilerParams(
            dimension_semantics=("parallel",),       # batch steps are independent
            vmem_limit_bytes=vmem_limit,
        ),
    )(context, question, mask_bias, w_cols, w_rows)

    if Lc_p != Lc:
        out = out[:, :Lc, :]
    return out


def bi_attention_reference(context, question, mask, params):
    """Pure-JAX reference mirroring the (intended) PyTorch forward."""
    B, Lc, D = context.shape
    Lq = question.shape[1]
    att_w, att_b, wi, wm = params["att_w"], params["att_b"], params["wi"], params["wm"]

    rc = jnp.broadcast_to(context[:, :, None, :], (B, Lc, Lq, D))
    rq = jnp.broadcast_to(question[:, None, :, :], (B, Lc, Lq, D))
    cq = rc * rq
    cat_mat = jnp.concatenate([rc, rq, cq], axis=-1)                        # (B, Lc, Lq, 3D)
    attention = jnp.einsum("bijk,k->bij", cat_mat, att_w[0]) + att_b[0]     # (B, Lc, Lq)
    masked = attention - 1e30 * (1.0 - mask[:, None, :])

    c_lin = context @ wi.T                                                  # (B, Lc, 1)
    q_lin = question @ wm.T                                                 # (B, Lq, 1)

    h_aware = jax.nn.softmax(masked, axis=-1)                               # (B, Lc, Lq)
    U = jnp.matmul(h_aware, q_lin)                                          # (B, Lc, 1)
    u_aware = jax.nn.softmax(jnp.max(masked, axis=-1), axis=-1)[:, None, :]  # (B, 1, Lc)
    H = jnp.matmul(u_aware, c_lin)                                          # (B, 1, 1)
    G = jnp.concatenate([c_lin, U, c_lin * U, U * H], axis=-1)              # (B, Lc, 4)
    return G


if __name__ == "__main__":
    def _run_case(B, Lc, Lq, hidden, seed=0):
        D = 2 * hidden  # input_size = 2 * hidden_size, so hidden*6 == 3*D
        key = jax.random.PRNGKey(seed)
        k1, k2, k3, k4, k5, k6, k7 = jax.random.split(key, 7)
        context = jax.random.normal(k1, (B, Lc, D), dtype=jnp.float32)
        question = jax.random.normal(k2, (B, Lq, D), dtype=jnp.float32)
        mask = (jax.random.uniform(k3, (B, Lq)) > 0.3).astype(jnp.float32)
        mask = mask.at[:, 0].set(1.0)  # guarantee at least one valid question position per row
        params = {
            "att_w": jax.random.normal(k4, (1, 6 * hidden), dtype=jnp.float32) * 0.1,
            "att_b": jax.random.normal(k5, (1,), dtype=jnp.float32) * 0.1,
            "wi": jax.random.normal(k6, (1, D), dtype=jnp.float32) * 0.1,
            "wm": jax.random.normal(k7, (1, D), dtype=jnp.float32) * 0.1,
        }

        out = jax.block_until_ready(bi_attention_forward(context, question, mask, params))
        ref = bi_attention_reference(context, question, mask, params)
        assert out.shape == (B, Lc, 4), out.shape
        err = float(jnp.max(jnp.abs(out - ref)))
        # bf16 score / e / q_lin MXU operands + approx EUP reciprocals => loosened tolerance.
        assert jnp.allclose(out, ref, atol=3e-2, rtol=3e-2), f"max abs err = {err:e}"

    _run_case(B=2, Lc=16, Lq=8, hidden=16)    # aligned shapes
    _run_case(B=3, Lc=10, Lq=6, hidden=16)    # exercises Lc/Lq padding + >=2-grid-step cap
    print("KERNEL_OK")
</pallas_src>

<mosaic_0001>
module attributes {stable_mosaic.version = 11 : i64} {
  func.func @bi_attention_kernel(%arg0: i32, %arg1: memref<1x16x32xf32, #tpu.memory_space<vmem>>, %arg2: memref<1x128x32xf32, #tpu.memory_space<vmem>>, %arg3: memref<1x1x128xf32, #tpu.memory_space<vmem>>, %arg4: memref<32x8xf32, #tpu.memory_space<vmem>>, %arg5: memref<8x32xf32, #tpu.memory_space<vmem>>, %arg6: memref<1x16x4xf32, #tpu.memory_space<vmem>>) attributes {dimension_semantics = [#tpu.dimension_semantics<parallel>], iteration_bounds = array<i64: 2>, scalar_prefetch = 0 : i64, scratch_operands = 0 : i64, tpu.core_type = #tpu.core_type<tc>, window_params = [{transform_indices = @transform_0, window_bounds = array<i64: 1, 16, 32>}, {transform_indices = @transform_1, window_bounds = array<i64: 1, 128, 32>}, {transform_indices = @transform_2, window_bounds = array<i64: 1, 1, 128>}, {pipeline_mode = #tpu.pipeline_mode<synchronous>, transform_indices = @transform_3, window_bounds = array<i64: 32, 8>}, {pipeline_mode = #tpu.pipeline_mode<synchronous>, transform_indices = @transform_4, window_bounds = array<i64: 8, 32>}, {transform_indices = @transform_5, window_bounds = array<i64: 1, 16, 4>}]} {
    %c0 = arith.constant 0 : index
    %c0_0 = arith.constant 0 : index
    %c0_1 = arith.constant 0 : index
    %0 = vector.load %arg1[%c0, %c0_0, %c0_1] : memref<1x16x32xf32, #tpu.memory_space<vmem>>, vector<1x16x32xf32>
    %c0_2 = arith.constant 0 : index
    %c0_3 = arith.constant 0 : index
    %c0_4 = arith.constant 0 : index
    %1 = vector.load %arg2[%c0_2, %c0_3, %c0_4] : memref<1x128x32xf32, #tpu.memory_space<vmem>>, vector<1x128x32xf32>
    %c0_5 = arith.constant 0 : index
    %c0_6 = arith.constant 0 : index
    %c0_7 = arith.constant 0 : index
    %2 = vector.load %arg3[%c0_5, %c0_6, %c0_7] : memref<1x1x128xf32, #tpu.memory_space<vmem>>, vector<1x1x128xf32>
    %c0_8 = arith.constant 0 : index
    %c0_9 = arith.constant 0 : index
    %3 = vector.load %arg4[%c0_8, %c0_9] : memref<32x8xf32, #tpu.memory_space<vmem>>, vector<32x8xf32>
    %c1 = arith.constant 1 : index
    %c0_10 = arith.constant 0 : index
    %4 = vector.load %arg5[%c1, %c0_10] : memref<8x32xf32, #tpu.memory_space<vmem>>, vector<1x32xf32>
    %c2 = arith.constant 2 : index
    %c0_11 = arith.constant 0 : index
    %5 = vector.load %arg5[%c2, %c0_11] : memref<8x32xf32, #tpu.memory_space<vmem>>, vector<1x32xf32>
    %6 = vector.shape_cast %0 : vector<1x16x32xf32> to vector<16x32xf32>
    %cst = arith.constant dense<0.000000e+00> : vector<16x8xf32>
    %7 = tpu.matmul %6, %3, %cst {dimension_numbers = #tpu.dot_dimension_numbers<[1], [0], [0], [1], [0, 0, 1, 1], [], []>} : vector<16x32xf32>, vector<32x8xf32>, vector<16x8xf32> -> vector<16x8xf32>
    %8 = vector.shape_cast %7 : vector<16x8xf32> to vector<1x16x8xf32>
    %9 = vector.shape_cast %1 : vector<1x128x32xf32> to vector<128x32xf32>
    %cst_12 = arith.constant dense<0.000000e+00> : vector<128x8xf32>
    %10 = tpu.matmul %9, %3, %cst_12 {dimension_numbers = #tpu.dot_dimension_numbers<[1], [0], [0], [1], [0, 0, 1, 1], [], []>} : vector<128x32xf32>, vector<32x8xf32>, vector<128x8xf32> -> vector<128x8xf32>
    %11 = vector.shape_cast %10 : vector<128x8xf32> to vector<1x128x8xf32>
    %12 = vector.extract_strided_slice %8 {offsets = [0, 0, 0], sizes = [1, 16, 1], strides = [1, 1, 1]} : vector<1x16x8xf32> to vector<1x16x1xf32>
    %13 = vector.extract_strided_slice %8 {offsets = [0, 0, 3], sizes = [1, 16, 1], strides = [1, 1, 1]} : vector<1x16x8xf32> to vector<1x16x1xf32>
    %14 = vector.extract_strided_slice %11 {offsets = [0, 0, 4], sizes = [1, 128, 1], strides = [1, 1, 1]} : vector<1x128x8xf32> to vector<1x128x1xf32>
    %15 = vector.shape_cast %4 : vector<1x32xf32> to vector<1x1x32xf32>
    %16 = vector.broadcast %15 : vector<1x1x32xf32> to vector<1x128x32xf32>
    %17 = arith.mulf %1, %16 : vector<1x128x32xf32>
    %cst_13 = arith.constant dense<0.000000e+00> : vector<1x128xf32>
    %18 = vector.multi_reduction <add>, %17, %cst_13 [2] : vector<1x128x32xf32> to vector<1x128xf32>
    %19 = arith.truncf %0 : vector<1x16x32xf32> to vector<1x16x32xbf16>
    %20 = vector.shape_cast %5 : vector<1x32xf32> to vector<1x1x32xf32>
    %21 = vector.broadcast %20 : vector<1x1x32xf32> to vector<1x128x32xf32>
    %22 = arith.mulf %1, %21 : vector<1x128x32xf32>
    %23 = arith.truncf %22 : vector<1x128x32xf32> to vector<1x128x32xbf16>
    "tpu.trace_start"() <{level = 10 : i32, message = "bld,bmd->blm"}> : () -> ()
    %cst_14 = arith.constant dense<0.000000e+00> : vector<1x16x128xf32>
    %24 = tpu.matmul %19, %23, %cst_14 {dimension_numbers = #tpu.dot_dimension_numbers<[2], [2], [1], [1], [0, 0, 0, 1, 1, 1], [0], [0]>} : vector<1x16x32xbf16>, vector<1x128x32xbf16>, vector<1x16x128xf32> -> vector<1x16x128xf32>
    "tpu.trace_stop"() : () -> ()
    %25 = vector.broadcast %12 : vector<1x16x1xf32> to vector<1x16x128xf32>
    %26 = arith.addf %24, %25 : vector<1x16x128xf32>
    %27 = vector.shape_cast %18 : vector<1x128xf32> to vector<1x1x128xf32>
    %28 = arith.addf %27, %2 : vector<1x1x128xf32>
    %29 = vector.broadcast %28 : vector<1x1x128xf32> to vector<1x16x128xf32>
    %30 = arith.addf %26, %29 : vector<1x16x128xf32>
    %cst_15 = arith.constant dense<0xFF800000> : vector<1x16xf32>
    %31 = vector.multi_reduction <maximumf>, %30, %cst_15 [2] : vector<1x16x128xf32> to vector<1x16xf32>
    %32 = vector.shape_cast %31 : vector<1x16xf32> to vector<1x16x1xf32>
    %33 = vector.broadcast %32 : vector<1x16x1xf32> to vector<1x16x128xf32>
    %34 = arith.subf %30, %33 : vector<1x16x128xf32>
    %35 = arith.truncf %34 : vector<1x16x128xf32> to vector<1x16x128xbf16>
    %36 = math.exp %35 : vector<1x16x128xbf16>
    %cst_16 = arith.constant 1.000000e+00 : f32
    %37 = vector.broadcast %cst_16 : f32 to vector<1x128x1xf32>
    %38 = tpu.concatenate %14, %37 in 2 : vector<1x128x1xf32>, vector<1x128x1xf32> -> vector<1x128x2xf32>
    %39 = arith.truncf %38 : vector<1x128x2xf32> to vector<1x128x2xbf16>
    "tpu.trace_start"() <{level = 10 : i32, message = "blm,bmn->bln"}> : () -> ()
    %cst_17 = arith.constant dense<0.000000e+00> : vector<1x16x2xf32>
    %40 = tpu.matmul %36, %39, %cst_17 {dimension_numbers = #tpu.dot_dimension_numbers<[2], [1], [1], [2], [0, 0, 0, 1, 1, 2], [0], [0]>} : vector<1x16x128xbf16>, vector<1x128x2xbf16>, vector<1x16x2xf32> -> vector<1x16x2xf32>
    "tpu.trace_stop"() : () -> ()
    %41 = vector.extract_strided_slice %40 {offsets = [0, 0, 0], sizes = [1, 16, 1], strides = [1, 1, 1]} : vector<1x16x2xf32> to vector<1x16x1xf32>
    %42 = vector.extract_strided_slice %40 {offsets = [0, 0, 1], sizes = [1, 16, 1], strides = [1, 1, 1]} : vector<1x16x2xf32> to vector<1x16x1xf32>
    %43 = tpu.reciprocal %42 {approx = true} : vector<1x16x1xf32> -> vector<1x16x1xf32>
    %44 = arith.mulf %41, %43 : vector<1x16x1xf32>
    %cst_18 = arith.constant dense<0xFF800000> : vector<1x1xf32>
    %45 = vector.multi_reduction <maximumf>, %32, %cst_18 [1] : vector<1x16x1xf32> to vector<1x1xf32>
    %46 = vector.shape_cast %45 : vector<1x1xf32> to vector<1x1x1xf32>
    %47 = vector.broadcast %46 : vector<1x1x1xf32> to vector<1x16x1xf32>
    %48 = arith.subf %32, %47 : vector<1x16x1xf32>
    %49 = math.exp %48 : vector<1x16x1xf32>
    %50 = arith.mulf %49, %13 : vector<1x16x1xf32>
    %cst_19 = arith.constant dense<0.000000e+00> : vector<1x1xf32>
    %51 = vector.multi_reduction <add>, %50, %cst_19 [1] : vector<1x16x1xf32> to vector<1x1xf32>
    %52 = vector.shape_cast %51 : vector<1x1xf32> to vector<1x1x1xf32>
    %cst_20 = arith.constant dense<0.000000e+00> : vector<1x1xf32>
    %53 = vector.multi_reduction <add>, %49, %cst_20 [1] : vector<1x16x1xf32> to vector<1x1xf32>
    %54 = vector.shape_cast %53 : vector<1x1xf32> to vector<1x1x1xf32>
    %55 = tpu.reciprocal %54 {approx = true} : vector<1x1x1xf32> -> vector<1x1x1xf32>
    %56 = arith.mulf %52, %55 : vector<1x1x1xf32>
    %57 = arith.mulf %13, %44 : vector<1x16x1xf32>
    %58 = vector.broadcast %56 : vector<1x1x1xf32> to vector<1x16x1xf32>
    %59 = arith.mulf %44, %58 : vector<1x16x1xf32>
    %60 = tpu.concatenate %13, %44, %57, %59 in 2 : vector<1x16x1xf32>, vector<1x16x1xf32>, vector<1x16x1xf32>, vector<1x16x1xf32> -> vector<1x16x4xf32>
    %c0_21 = arith.constant 0 : index
    %c0_22 = arith.constant 0 : index
    %c0_23 = arith.constant 0 : index
    %61 = vector.load %arg6[%c0_21, %c0_22, %c0_23] : memref<1x16x4xf32, #tpu.memory_space<vmem>>, vector<1x16x4xf32>
    tpu.vector_store %arg6[%c0_21, %c0_22, %c0_23], %60 {strides = array<i32>} : memref<1x16x4xf32, #tpu.memory_space<vmem>>, vector<1x16x4xf32>,
    return
  }
  func.func @transform_0(%arg0: i32) -> (i32, i32, i32) {
    %c0_i32 = arith.constant 0 : i32
    %c0_i32_0 = arith.constant 0 : i32
    %c0_i32_1 = arith.constant 0 : i32
    return %arg0, %c0_i32, %c0_i32_0 : i32, i32, i32
  }
  func.func @transform_1(%arg0: i32) -> (i32, i32, i32) {
    %c0_i32 = arith.constant 0 : i32
    %c0_i32_0 = arith.constant 0 : i32
    %c0_i32_1 = arith.constant 0 : i32
    return %arg0, %c0_i32, %c0_i32_0 : i32, i32, i32
  }
  func.func @transform_2(%arg0: i32) -> (i32, i32, i32) {
    %c0_i32 = arith.constant 0 : i32
    %c0_i32_0 = arith.constant 0 : i32
    %c0_i32_1 = arith.constant 0 : i32
    return %arg0, %c0_i32, %c0_i32_0 : i32, i32, i32
  }
  func.func @transform_3(%arg0: i32) -> (i32, i32) {
    %c0_i32 = arith.constant 0 : i32
    %c0_i32_0 = arith.constant 0 : i32
    %c0_i32_1 = arith.constant 0 : i32
    return %c0_i32, %c0_i32_0 : i32, i32
  }
  func.func @transform_4(%arg0: i32) -> (i32, i32) {
    %c0_i32 = arith.constant 0 : i32
    %c0_i32_0 = arith.constant 0 : i32
    %c0_i32_1 = arith.constant 0 : i32
    return %c0_i32, %c0_i32_0 : i32, i32
  }
  func.func @transform_5(%arg0: i32) -> (i32, i32, i32) {
    %c0_i32 = arith.constant 0 : i32
    %c0_i32_0 = arith.constant 0 : i32
    %c0_i32_1 = arith.constant 0 : i32
    return %arg0, %c0_i32, %c0_i32_0 : i32, i32, i32
  }
}

</mosaic_0001>

<bundles_post_ra>
// kernel: tpu_custom_call.1
= control target key start
LH: loop header
LB: loop body
LE: loop exit
PB: predicated region body
PF: predicated region fallthrough
CT: control target
= control target key end

     0   :  { %s1426_s18 = smov 0   ;;  %s1779_s0 = inlined_call_operand.vmem [shape: f32[2,16,32], index: 0, kind: input, shape index: {}]   ;;  %s1780_s1 = inlined_call_operand.vmem [shape: f32[2,128,32], index: 1, kind: input, shape index: {}]   ;;  %s1781_s2 = inlined_call_operand.vmem [shape: f32[2,1,128], index: 2, kind: input, shape index: {}]   ;;  %s1782_s3 = inlined_call_operand.vmem [shape: f32[32,8], index: 3, kind: input, shape index: {}]   ;;  %s1783_s4 = inlined_call_operand.vmem [shape: f32[8,32], index: 4, kind: input, shape index: {}]   ;;  %s1784_s5 = inlined_call_operand.vmem [shape: f32[2,16,4], index: 5, kind: output, shape index: {}]  }
   0x1 LB: > { %s1253_s19 = sadd.s32 4294967295, %s1388_s18   ;;  %p1257_p0 = scmp.ge.s32.totalorder %s1388_s18, 1  ;;  %s1388_s18 = sphi %s1426_s18, %s15_s18  }
   0x2   : > { %p205_p1 = scmp.lt.s32.totalorder %s1388_s18, 3 }
   0x4   : > { %p206_p2 = pnand %p1257_p0, %p205_p1 }
   0x5   : > { %p241_p3 = scmp.lt.s32.totalorder (!%p206_p2), %s1253_s19, 1  ;;  %s1391_s20 = smov (!%p206_p2), 124  }
   0x6   : > { %209 = sbr.rel (%p206_p2) target bundleno = 1150 (0x47e), region = 40  ;;  %s1392_s21 = smov (!%p206_p2), 127  }
   0x7   : > { %s1394_s23 = smov (!%p206_p2), 125   ;;  %s1395_s24 = smov (!%p206_p2), 1  }
   0xb   : > { %v625_v0 = vlaneseq  ;;  %s1786_s19 = smov (!%p241_p3, %s1253_s19), 1  ;;  %v1442_v2 = vld [vmem:[%s1783_s4 + $0x1] ss:$0 sm:$0xff]  ;;  %vm284_vm0 = vcmask 261120   ;;  %v281_v59 = vld [vmem:[%s1782_s3 + $0x18] sm:$0xff]  ;;  %v280_v61 = vld [vmem:[%s1782_s3 + $0x10] sm:$0xff] }
   0xc   : > { %s1286_s22 = sshll.u32 %s1786_s19, 7  ;;  %s253_s25 = scalar_lea.vmem %s1781_s2, %s1786_s19  ;;  %1288 = vmatpush.msra.mxu1 %v281_v59  ;;  %374 = vmatpush.msra.mxu0 %v281_v59  ;;  %v279_v62 = vld [vmem:[%s1782_s3 + $0x8] sm:$0xff]  ;;  %vm822_vm1 = vcmask 130112   ;;  %vm826_vm2 = vcmask 195712   ;;  %vm830_vm3 = vcmask 261312   ;;  %vm834_vm4 = vcmask 326912  }
   0xd   : > { %v1435_v1 = vshrl.u32 %v625_v0, 7  ;;  %s1455_s28 = scalar_lea.vmem %s1780_s1, %s1286_s22  ;;  %v1472_v12 = vld [vmem:[%s253_s25] ss:$0 sm:$0xff]  ;;  %303 = vmatpush.msra.mxu3 %v281_v59  ;;  %s1285_s12 = sshll.u32 %s1786_s19, 4  ;;  %vm838_vm5 = vcmask 392512   ;;  %vm842_vm6 = vcmask 458112  }
   0xe   : > { %v1458_v5 = vld [vmem:[%s1455_s28 + $0x10] sm:$0xff]  ;;  %v1461_v6 = vld [vmem:[%s1455_s28] sm:$0xff]  ;;  %v1468_v9 = vld [vmem:[%s1455_s28 + $0x8] sm:$0xff]  ;;  %1289 = vmatpush.msra.mxu1 %v280_v61  ;;  %375 = vmatpush.msra.mxu0 %v280_v61  ;;  %s1588_s15 = scalar_lea.vmem %s1779_s0, %s1285_s12  ;;  %vm846_vm7 = vcmask 523712   ;;  %vm850_vm8 = vcmask 589312   ;;  %vm854_vm9 = vcmask 654912   ;;  %s258_s27 = scalar_lea.vmem %s1784_s5, %s1285_s12 }
   0xf   : > { %v633_v3 = vadd.s32 8, %v1435_v1  ;;  %1306 = vset.pattern.permute.xlu1 %v1435_v1  ;;  %v639_v4 = vadd.s32 16, %v1435_v1  ;;  %v430_v7 = vmul.f32 %v1442_v2, %v1458_v5  ;;  %v428_v8 = vmul.f32 %v1442_v2, %v1461_v6  ;;  %v1482_v16 = vld [vmem:[%s1455_s28 + $0x18] sm:$0xff]  ;;  %v1489_v20 = vld [vmem:[%s1455_s28 + $0x20] sm:$0xff]  ;;  %v1494_v22 = vld [vmem:[%s1455_s28 + $0x28] sm:$0xff]  ;;  %304 = vmatpush.msra.mxu3 %v280_v61  ;;  %s1393_s22 = smov 3  }
  0x10   : > { %v429_v13 = vmul.f32 %v1442_v2, %v1468_v9  ;;  %v645_v15 = vadd.s32 24, %v1435_v1  ;;  %v431_v17 = vmul.f32 %v1442_v2, %v1482_v16  ;;  %v681_v19 = vadd.s32 72, %v1435_v1  ;;  %v1500_v25 = vld [vmem:[%s1455_s28 + $0x30] sm:$0xff]  ;;  %v1506_v28 = vld [vmem:[%s1455_s28 + $0x48] sm:$0xff]  ;;  %v1514_v32 = vld [vmem:[%s1455_s28 + $0x38] sm:$0xff]  ;;  %1290 = vmatpush.msra.mxu1 %v279_v62  ;;  %376 = vmatpush.msra.mxu0 %v279_v62 }
  0x11   : > { %1307 = vset.pattern.permute.xlu2 %v633_v3  ;;  %1308 = vset.pattern.permute.xlu0 %v639_v4  ;;  %v450_v10 = vsel %vm284_vm0, %v430_v7, 0.0  ;;  %v444_v11 = vsel %vm284_vm0, %v428_v8, 0.0  ;;  %v432_v21 = vmul.f32 %v1442_v2, %v1489_v20  ;;  %v433_v23 = vmul.f32 %v1442_v2, %v1494_v22  ;;  %v1522_v37 = vld [vmem:[%s1455_s28 + $0x40] sm:$0xff]  ;;  %v1545_v53 = vld [vmem:[%s1455_s28 + $0x68] sm:$0xff]  ;;  %v1548_v54 = vld [vmem:[%s1455_s28 + $0x58] sm:$0xff] }
  0x12   : > { %451 = vadd.xlane.f32.xlu1 %v450_v10  ;;  %445 = vadd.xlane.f32.xlu0 %v444_v11  ;;  %v447_v14 = vsel %vm284_vm0, %v429_v13, 0.0  ;;  %v453_v18 = vsel %vm284_vm0, %v431_v17, 0.0  ;;  %v434_v27 = vmul.f32 %v1442_v2, %v1500_v25  ;;  %v437_v29 = vmul.f32 %v1442_v2, %v1506_v28  ;;  %v278_v3 = vld [vmem:[%s1782_s3] sm:$0xff]  ;;  %v1570_v4 = vld [vmem:[%s1455_s28 + $0x50] sm:$0xff] }
  0x13   : > { %v456_v24 = vsel %vm284_vm0, %v432_v21, 0.0  ;;  %v459_v26 = vsel %vm284_vm0, %v433_v23, 0.0  ;;  %v651_v31 = vadd.s32 32, %v1435_v1  ;;  %v675_v33 = vadd.s32 64, %v1435_v1  ;;  %305 = vmatpush.msra.mxu3 %v279_v62  ;;  %1291 = vmatpush.msra.mxu1 %v278_v3  ;;  %v273_v13 = vld [vmem:[%s1455_s28 + $0x60] sm:$0xff] }
  0x14   : > { %v462_v30 = vsel %vm284_vm0, %v434_v27, 0.0  ;;  %v471_v34 = vsel %vm284_vm0, %v437_v29, 0.0  ;;  %v435_v35 = vmul.f32 %v1442_v2, %v1514_v32  ;;  %v436_v38 = vmul.f32 %v1442_v2, %v1522_v37  ;;  %1274 = vmatmul.msk.f32.vlgmr.msra.gmra.mxu1 %vm284_vm0, %v1522_v37  ;;  %377 = vmatpush.msra.mxu0 %v278_v3 }
  0x15   : > { %v657_v40 = vadd.s32 40, %v1435_v1  ;;  %v687_v41 = vadd.s32 80, %v1435_v1  ;;  %v663_v42 = vadd.s32 48, %v1435_v1  ;;  %v669_v44 = vadd.s32 56, %v1435_v1  ;;  %1266 = vmatmul.msk.f32.vlgmr.msra.gmra.mxu0 %vm284_vm0, %v1461_v6  ;;  %306 = vmatpush.msra.mxu3 %v278_v3 }
  0x16   : > { %v465_v36 = vsel %vm284_vm0, %v435_v35, 0.0  ;;  %v468_v39 = vsel %vm284_vm0, %v436_v38, 0.0  ;;  %v711_v49 = vadd.s32 112, %v1435_v1  ;;  %v699_v52 = vadd.s32 96, %v1435_v1  ;;  %v1625_v35 = vld [vmem:[%s1783_s4 + $0x2] ss:$0 sm:$0xff] }
  0x17   : > { %v441_v55 = vmul.f32 %v1442_v2, %v1545_v53  ;;  %v439_v56 = vmul.f32 %v1442_v2, %v1548_v54  ;;  %v693_v63 = vadd.s32 88, %v1435_v1  ;;  %v438_v7 = vmul.f32 %v1442_v2, %v1570_v4 }
  0x18   : > { %v705_v27 = vadd.s32 104, %v1435_v1  ;;  %vm858_vm10 = vcmask 720512   ;;  %vm862_vm11 = vcmask 786112   ;;  %vm866_vm12 = vcmask 851712  }
  0x19   : > { %635 = vperm.xlu2 %1307, %v1472_v12   ;;  %v483_v57 = vsel %vm284_vm0, %v441_v55, 0.0  ;;  %v477_v58 = vsel %vm284_vm0, %v439_v56, 0.0  ;;  %v474_v11 = vsel %vm284_vm0, %v438_v7, 0.0  ;;  %v505_v56 = vmul.f32 %v1625_v35, %v1570_v4 }
  0x1a   : > { %448 = vadd.xlane.f32.xlu0 %v447_v14  ;;  %v440_v14 = vmul.f32 %v1442_v2, %v273_v13  ;;  %vm870_vm13 = vcmask 917312   ;;  %vm874_vm14 = vcmask 982912   ;;  %vm878_vm15 = vcmask 1048512  }
  0x1b   : > { %v521_v61 = vpack.c.bf16 %v505_v56, %v505_v56 }
  0x1c   : > { %1275 = vmatmul.msk.f32.gmra.mxu1 %vm284_vm0, %v1506_v28  ;;  %v480_v17 = vsel %vm284_vm0, %v440_v14, 0.0 }
  0x1d   : > { %1267 = vmatmul.msk.f32.gmra.mxu0 %vm284_vm0, %v1468_v9 }
  0x21   : > { %1309 = vset.pattern.permute.xlu2 %v645_v15  ;;  %v1595_v15 = vld [vmem:[%s1588_s15] sm:$0xff] }
  0x22   : > { %1264 = vmatmul.msk.f32.vlgmr.msra.gmra.mxu3 %vm284_vm0, %v1595_v15 }
  0x24   : > { %1276 = vmatmul.msk.f32.gmra.mxu1 %vm284_vm0, %v1570_v4  ;;  %v503_v4 = vmul.f32 %v1625_v35, %v1522_v37  ;;  %v502_v37 = vmul.f32 %v1625_v35, %v1514_v32 }
  0x25   : > { %1268 = vmatmul.msk.f32.gmra.mxu0 %vm284_vm0, %v1458_v5 }
  0x2b   : > { %629 = vperm.xlu1 %1306, %v1472_v12  }
  0x2c   : > { %1277 = vmatmul.msk.f32.gmra.mxu1 %vm284_vm0, %v1548_v54 }
  0x2d   : > { %1269 = vmatmul.msk.f32.gmra.mxu0 %vm284_vm0, %v1482_v16 }
  0x2e   : > { %641 = vperm.xlu0 %1308, %v1472_v12  }
  0x33   : > { %1314 = vset.pattern.permute.xlu1 %v675_v33 }
  0x34   : > { %1278 = vmatmul.msk.f32.gmra.mxu1 %vm284_vm0, %v273_v13 }
  0x35   : > { %1270 = vmatmul.msk.f32.gmra.mxu0 %vm284_vm0, %v1489_v20 }
  0x36   : > { %1315 = vset.pattern.permute.xlu0 %v681_v19 }
  0x3c   : > { %1279 = vmatmul.msk.f32.gmra.mxu1 %vm284_vm0, %v1545_v53 }
  0x3d   : > { %1271 = vmatmul.msk.f32.gmra.mxu0 %vm284_vm0, %v1494_v22 }
  0x42   : > { %454 = vadd.xlane.f32.xlu2 %v453_v18 }
  0x45   : > { %1272 = vmatmul.msk.f32.gmra.mxu0 %vm284_vm0, %v1500_v25 }
  0x4d   : > { %1273 = vmatmul.msk.f32.gmra.mxu0 %vm284_vm0, %v1514_v32  ;;  %v500_v32 = vmul.f32 %v1625_v35, %v1494_v22 }
  0x55   : > { %457 = vadd.xlane.f32.xlu1 %v456_v24 }
  0x58   : > { %460 = vadd.xlane.f32.xlu0 %v459_v26  ;;  %v1390_v26 = vmov 0  }
  0x5a   : > { %647 = vperm.xlu2 %1309, %v1472_v12  }
  0x5d   : > { %463 = vadd.xlane.f32.xlu1 %v462_v30 }
  0x60   : > { %472 = vadd.xlane.f32.xlu0 %v471_v34  ;;  %v276_v34 = vld [vmem:[%s1455_s28 + $0x78] sm:$0xff] }
  0x62   : > { %1310 = vset.pattern.permute.xlu2 %v651_v31 }
  0x65   : > { %466 = vadd.xlane.f32.xlu1 %v465_v36  ;;  %v275_v36 = vld [vmem:[%s1455_s28 + $0x70] sm:$0xff] }
  0x66   : > { %v509_v38 = vmul.f32 %v1625_v35, %v275_v36  ;;  %1280 = vmatmul.msk.f32.gmra.mxu1 %vm284_vm0, %v275_v36 }
  0x6a   : > { %653 = vperm.xlu2 %1310, %v1472_v12  }
  0x6d   : > { %469 = vadd.xlane.f32.xlu1 %v468_v39  ;;  %v510_v39 = vmul.f32 %v1625_v35, %v276_v34 }
  0x6e   : > { %1281 = vmatmul.msk.f32.gmra.mxu1 %vm284_vm0, %v276_v34 }
  0x72   : > { %1311 = vset.pattern.permute.xlu2 %v657_v40  ;;  %v525_v40 = vpack.c.bf16 %v509_v38, %v509_v38  ;;  %v518_v38 = vpack.c.bf16 %v502_v37, %v502_v37 }
  0x73   : > { %v636_v45 = vpop.permute.xlu2 %635 }
  0x74   : > { %683 = vperm.xlu0 %1315, %v1472_v12  }
  0x7a   : > { %659 = vperm.xlu2 %1311, %v1472_v12  }
  0x7c   : > { %1316 = vset.pattern.permute.xlu0 %v687_v41  ;;  %v526_v41 = vpack.c.bf16 %v510_v39, %v510_v39  ;;  %v442_v39 = vmul.f32 %v1442_v2, %v275_v36 }
  0x82   : > { %1312 = vset.pattern.permute.xlu2 %v663_v42  ;;  %v1635_v42 = vld [vmem:[%s1588_s15 + $0x8] sm:$0xff] }
  0x83   : > { %1265 = vmatmul.msk.f32.gmra.mxu3 %vm284_vm0, %v1635_v42 }
  0x84   : > { %689 = vperm.xlu0 %1316, %v1472_v12  }
  0x85   : > { %v446_v43 = vpop.xlane.xlu0 %445  ;;  %v452_v48 = vpop.xlane.xlu1 %451 }
  0x86   : > { %677 = vperm.xlu1 %1314, %v1472_v12  }
  0x8a   : > { %665 = vperm.xlu2 %1312, %v1472_v12  }
  0x8c   : > { %1320 = vset.pattern.permute.xlu0 %v711_v49  ;;  %v507_v49 = vmul.f32 %v1625_v35, %v273_v13 }
  0x8d   : > { %v449_v46 = vpop.xlane.xlu0 %448 }
  0x8e   : > { %v1537_v47 = vadd.f32 %v636_v45, %v449_v46  ;;  %1318 = vset.pattern.permute.xlu1 %v699_v52  ;;  %v523_v52 = vpack.c.bf16 %v507_v49, %v507_v49 }
  0x90   : > { %v570_v59 = vunpack.c.l.b16 %v523_v52  ;;  %v497_v52 = vmul.f32 %v1625_v35, %v1458_v5 }
  0x92   : > { %1313 = vset.pattern.permute.xlu2 %v669_v44  ;;  %v573_v44 = vunpack.c.l.b16 %v526_v41  ;;  %v565_v41 = vunpack.c.l.b16 %v518_v38 }
  0x9a   : > { %671 = vperm.xlu2 %1313, %v1472_v12  }
  0x9d   : > { %v630_v50 = vpop.permute.xlu1 %629 }
  0x9e   : > { %v1541_v51 = vadd.f32 %v630_v50, %v446_v43  ;;  %v572_v43 = vunpack.c.l.b16 %v525_v40  ;;  %v508_v50 = vmul.f32 %v1625_v35, %v1545_v53 }
  0xa0   : > { %v642_v18 = vpop.permute.xlu0 %641  ;;  %v581_v45 = vpack.c.b16 %v573_v44, %v572_v43  ;;  %v524_v55 = vpack.c.bf16 %v508_v50, %v508_v50  ;;  %v486_v43 = vsel %vm284_vm0, %v442_v39, 0.0 }
  0xa1   : > { %v739_v23 = vadd.f32 %v642_v18, %v452_v48 }
  0xa2   : > { %1317 = vset.pattern.permute.xlu2 %v693_v63  ;;  %v607_v48 = vsel %vm284_vm0, %v581_v45, 0  ;;  %v568_v63 = vunpack.c.l.b16 %v521_v61  ;;  %v496_v61 = vmul.f32 %v1625_v35, %v1468_v9 }
  0xa3   : > { %609 = vmatpush.bf16.xpose.msra.mxu2 %v607_v48  ;;  %v516_v48 = vpack.c.bf16 %v500_v32, %v500_v32 }
  0xa4   : > { %v512_v5 = vpack.c.bf16 %v496_v61, %v496_v61 }
  0xae   : > { %484 = vadd.xlane.f32.xlu0 %v483_v57  ;;  %v506_v57 = vmul.f32 %v1625_v35, %v1548_v54 }
  0xb0   : > { %478 = vadd.xlane.f32.xlu1 %v477_v58  ;;  %v717_v58 = vadd.s32 120, %v1435_v1  ;;  %v522_v53 = vpack.c.bf16 %v506_v57, %v506_v57 }
  0xb2   : > { %v569_v3 = vunpack.c.l.b16 %v522_v53 }
  0xb4   : > { %v579_v54 = vpack.c.b16 %v569_v3, %v568_v63  ;;  %v559_v63 = vunpack.c.l.b16 %v512_v5  ;;  %v493_v3 = vpack.c.bf16 %v1635_v42, %v1635_v42 }
  0xb5   : > { %v455_v60 = vpop.xlane.xlu2 %454 }
  0xb6   : > { %v601_v1 = vsel %vm284_vm0, %v579_v54, 0 }
  0xbd   : > { %v648_v8 = vpop.permute.xlu2 %647 }
  0xbe   : > { %v1578_v10 = vadd.f32 %v648_v8, %v455_v60  ;;  %v571_v60 = vunpack.c.l.b16 %v524_v55  ;;  %v498_v55 = vmul.f32 %v1625_v35, %v1482_v16  ;;  %v492_v16 = vpack.c.bf16 %v1595_v15, %v1595_v15 }
  0xc0   : > { %v580_v62 = vpack.c.b16 %v571_v60, %v570_v59  ;;  %v514_v56 = vpack.c.bf16 %v498_v55, %v498_v55  ;;  %v495_v60 = vmul.f32 %v1625_v35, %v1461_v6  ;;  %v539_v9 = vunpack.c.l.b16 %v492_v16 }
  0xc2   : > { %713 = vperm.xlu0 %1320, %v1472_v12   ;;  %v604_v7 = vsel %vm284_vm0, %v580_v62, 0  ;;  %v561_v22 = vunpack.c.l.b16 %v514_v56  ;;  %v511_v53 = vpack.c.bf16 %v495_v60, %v495_v60 }
  0xc3   : > { %475 = vadd.xlane.f32.xlu2 %v474_v11  ;;  %610 = vmatpush.bf16.xpose.msra.mxu2 %v604_v7  ;;  %v504_v11 = vmul.f32 %v1625_v35, %v1506_v28 }
  0xc4   : > { %v558_v62 = vunpack.c.l.b16 %v511_v53 }
  0xc5   : > { %v654_v19 = vpop.permute.xlu2 %653  ;;  %v520_v18 = vpack.c.bf16 %v504_v11, %v504_v11 }
  0xc8   : > { %v458_v21 = vpop.xlane.xlu1 %457 }
  0xc9   : > { %v1602_v24 = vadd.f32 %v654_v19, %v458_v21  ;;  %701 = vperm.xlu1 %1318, %v1472_v12   ;;  %v567_v21 = vunpack.c.l.b16 %v520_v18 }
  0xca   : > { %1324 = vset.pattern.permute.xlu0 %v1390_v26 }
  0xcb   : > { %481 = vadd.xlane.f32.xlu2 %v480_v17  ;;  %776 = vperm.xlu0 %1324, %v739_v23   ;;  %v461_v29 = vpop.xlane.xlu0 %460  ;;  %v519_v17 = vpack.c.bf16 %v503_v4, %v503_v4  ;;  %v443_v23 = vmul.f32 %v1442_v2, %v276_v34  ;;  %v563_v2 = vunpack.c.l.b16 %v516_v48 }
  0xcc   : > { %611 = vmatpush.bf16.xpose.msra.mxu2 %v601_v1 }
  0xcd   : > { %v566_v19 = vunpack.c.l.b16 %v519_v17  ;;  %v489_v28 = vsel %vm284_vm0, %v443_v23, 0.0 }
  0xd0   : > { %v1619_v33 = vpop.xlane.xlu1 %463 }
  0xd1   : > { %1319 = vset.pattern.permute.xlu1 %v705_v27  ;;  %v578_v27 = vpack.c.b16 %v567_v21, %v566_v19 }
  0xd3   : > { %v473_v7 = vpop.xlane.xlu0 %472 }
  0xd4   : > { %v660_v30 = vpop.permute.xlu2 %659 }
  0xd5   : > { %v742_v31 = vadd.f32 %v660_v30, %v461_v29  ;;  %v598_v29 = vsel %vm284_vm0, %v578_v27, 0  ;;  %v501_v30 = vmul.f32 %v1625_v35, %v1500_v25  ;;  %v499_v25 = vmul.f32 %v1625_v35, %v1489_v20  ;;  %v379_v27 = vpop.f32.mrf.mxu0 }
  0xd6   : > { %612 = vmatpush.bf16.xpose.msra.mxu2 %v598_v29  ;;  %v513_v20 = vpack.c.bf16 %v497_v52, %v497_v52  ;;  %v540_v35 = vunpack.c.l.b16 %v493_v3  ;;  %v1717_v3 = vand.u32 127, %v625_v0 }
  0xd7   : > { %785 = vperm.xlu0 %1324, %v742_v31   ;;  %v517_v31 = vpack.c.bf16 %v501_v30, %v501_v30  ;;  %v515_v45 = vpack.c.bf16 %v499_v25, %v499_v25 }
  0xd8   : > { %v1641_v46 = vpop.xlane.xlu1 %466  ;;  %v560_v57 = vunpack.c.l.b16 %v513_v20 }
  0xd9   : > { %707 = vperm.xlu1 %1319, %v1472_v12   ;;  %v564_v40 = vunpack.c.l.b16 %v517_v31  ;;  %v562_v49 = vunpack.c.l.b16 %v515_v45 }
  0xdb   : > { %v577_v34 = vpack.c.b16 %v565_v41, %v564_v40  ;;  %v576_v36 = vpack.c.b16 %v563_v2, %v562_v49  ;;  %v1702_v40 = vpop.f32.mrf.mxu3 }
  0xdd   : > { %v595_v44 = vsel %vm284_vm0, %v577_v34, 0  ;;  %v592_v50 = vsel %vm284_vm0, %v576_v36, 0 }
  0xde   : > { %613 = vmatpush.bf16.xpose.msra.mxu2 %v595_v44 }
  0xe0   : > { %v470_v8 = vpop.xlane.xlu1 %469 }
  0xe1   : > { %1322 = vset.pattern.permute.xlu1 %v1390_v26 }
  0xe3   : > { %695 = vperm.xlu2 %1317, %v1472_v12  }
  0xe4   : > { %v666_v54 = vpop.permute.xlu2 %665 }
  0xe5   : > { %v743_v1 = vadd.f32 %v666_v54, %v1619_v33 }
  0xe6   : > { %614 = vmatpush.bf16.xpose.msra.mxu2 %v592_v50  ;;  %v684_v4 = vpop.permute.xlu0 %683 }
  0xe7   : > { %v746_v15 = vadd.f32 %v684_v4, %v473_v7 }
  0xeb   : > { %1321 = vset.pattern.permute.xlu2 %v717_v58  ;;  %v575_v58 = vpack.c.b16 %v561_v22, %v560_v57 }
  0xed   : > { %v589_v59 = vsel %vm284_vm0, %v575_v58, 0 }
  0xee   : > { %615 = vmatpush.bf16.xpose.msra.mxu2 %v589_v59 }
  0xf4   : > { %v672_v42 = vpop.permute.xlu2 %671 }
  0xf6   : > { %v690_v21 = vpop.permute.xlu0 %689 }
  0xf8   : > { %v678_v13 = vpop.permute.xlu1 %677 }
  0xf9   : > { %v745_v14 = vadd.f32 %v678_v13, %v470_v8  ;;  %v574_v8 = vpack.c.b16 %v559_v63, %v558_v62 }
  0xfb   : > { %794 = vperm.xlu0 %1324, %v745_v14   ;;  %v586_v6 = vsel %vm284_vm0, %v574_v8, 0  ;;  %v403_v14 = vpop.f32.mrf.mxu1  ;;  %v820_v8 = vadd.s32 4294967288, %v1717_v3 }
  0xfc   : > { %616 = vmatpush.bf16.xpose.msra.mxu2 %v586_v6  ;;  %v828_v6 = vadd.s32 4294967272, %v1717_v3 }
 0x103   : > { %490 = vadd.xlane.f32.xlu1 %v489_v28  ;;  %v406_v18 = vpop.f32.mrf.mxu1  ;;  %v382_v28 = vpop.f32.mrf.mxu0 }
 0x104   : > { %v1340_v19 = vpack.i.bf16 %v406_v18, %v403_v14  ;;  %v1360_v38 = vpack.i.bf16 %v382_v28, %v379_v27  ;;  %v840_v18 = vadd.s32 4294967248, %v1717_v3  ;;  %v848_v27 = vadd.s32 4294967232, %v1717_v3 }
 0x105   : > { %v852_v28 = vadd.s32 4294967224, %v1717_v3 }
 0x106   : > { %v1706_v2 = vpop.f32.mrf.mxu3 }
 0x10b   : > { %v385_v34 = vpop.f32.mrf.mxu0 }
 0x10c   : > { %487 = vadd.xlane.f32.xlu2 %v486_v43 }
 0x113   : > { %v388_v43 = vpop.f32.mrf.mxu0 }
 0x114   : > { %v1355_v60 = vpack.i.bf16 %v388_v43, %v385_v34 }
 0x11b   : > { %v391_v44 = vpop.f32.mrf.mxu0 }
 0x11c   : > { %770 = vperm.xlu1 %1322, %v1541_v51   ;;  %v541_v51 = vpack.c.b16 %v540_v35, %v539_v9  ;;  %v824_v9 = vadd.s32 4294967280, %v1717_v3  ;;  %v832_v35 = vadd.s32 4294967264, %v1717_v3 }
 0x11e   : > { %1282 = vmatmul.msk.bf16.vlgmr.msra.gmra.mxu2 %vm284_vm0, %v541_v51  ;;  %vm975_vm0 = vcmask 7168  }
 0x121   : > { %v485_v37 = vpop.xlane.xlu0 %484 }
 0x123   : > { %v479_v11 = vpop.xlane.xlu1 %478  ;;  %v394_v50 = vpop.f32.mrf.mxu0 }
 0x124   : > { %719 = vperm.xlu2 %1321, %v1472_v12   ;;  %788 = vperm.xlu1 %1322, %v743_v1   ;;  %v1350_v59 = vpack.i.bf16 %v394_v50, %v391_v44  ;;  %v868_v50 = vadd.s32 4294967192, %v1717_v3 }
 0x12b   : > { %v397_v57 = vpop.f32.mrf.mxu0 }
 0x12c   : > { %1323 = vset.pattern.permute.xlu2 %v1390_v26  ;;  %797 = vperm.xlu1 %1322, %v746_v15   ;;  %v744_v26 = vadd.f32 %v672_v42, %v1641_v46 }
 0x12d   : > { %773 = vperm.xlu2 %1323, %v1537_v47  }
 0x133   : > { %v400_v22 = vpop.f32.mrf.mxu0 }
 0x134   : > { %v714_v25 = vpop.permute.xlu0 %713  ;;  %v1345_v58 = vpack.i.bf16 %v400_v22, %v397_v57  ;;  %v876_v57 = vadd.s32 4294967176, %v1717_v3 }
 0x135   : > { %779 = vperm.xlu2 %1323, %v1578_v10   ;;  %v409_v10 = vpop.f32.mrf.mxu1 }
 0x136   : > { %v476_v13 = vpop.xlane.xlu2 %475 }
 0x137   : > { %v747_v29 = vadd.f32 %v690_v21, %v476_v13  ;;  %v836_v13 = vadd.s32 4294967256, %v1717_v3 }
 0x13b   : > { %v702_v33 = vpop.permute.xlu1 %701 }
 0x13d   : > { %782 = vperm.xlu2 %1323, %v1602_v24   ;;  %v412_v31 = vpop.f32.mrf.mxu1  ;;  %v777_v62 = vpop.permute.xlu0 %776 }
 0x13e   : > { %v482_v12 = vpop.xlane.xlu2 %481  ;;  %v1335_v20 = vpack.i.bf16 %v412_v31, %v409_v10  ;;  %v825_v0 = vperm.slane %v777_v62, %v824_v9 }
 0x13f   : > { %v749_v17 = vadd.f32 %v702_v33, %v482_v12 }
 0x141   : > { %806 = vperm.xlu1 %1322, %v749_v17   ;;  %v844_v17 = vadd.s32 4294967240, %v1717_v3 }
 0x145   : > { %791 = vperm.xlu2 %1323, %v744_v26   ;;  %v415_v39 = vpop.f32.mrf.mxu1 }
 0x146   : > { %v696_v47 = vpop.permute.xlu2 %695 }
 0x147   : > { %v748_v23 = vadd.f32 %v696_v47, %v479_v11 }
 0x149   : > { %803 = vperm.xlu0 %1324, %v748_v23   ;;  %v786_v7 = vpop.permute.xlu0 %785 }
 0x14a   : > { %v837_v26 = vperm.slane %v786_v7, %v836_v13 }
 0x14b   : > { %v708_v30 = vpop.permute.xlu1 %707 }
 0x14c   : > { %v750_v24 = vadd.f32 %v708_v30, %v485_v37 }
 0x14d   : > { %800 = vperm.xlu2 %1323, %v747_v29   ;;  %v418_v46 = vpop.f32.mrf.mxu1 }
 0x14e   : > { %v1330_v41 = vpack.i.bf16 %v418_v46, %v415_v39 }
 0x155   : > { %809 = vperm.xlu2 %1323, %v750_v24   ;;  %v421_v48 = vpop.f32.mrf.mxu1  ;;  %v856_v24 = vadd.s32 4294967216, %v1717_v3 }
 0x15d   : > { %529 = vperm.xlu2 %1323, %v1702_v40   ;;  %v424_v55 = vpop.f32.mrf.mxu1 }
 0x15e   : > { %v1325_v56 = vpack.i.bf16 %v424_v55, %v421_v48  ;;  %v872_v55 = vadd.s32 4294967184, %v1717_v3 }
 0x165   : > { %1331 = vrot.lane.b32.xlu2 %v1330_v41, %s1391_s20 }
 0x16d   : > { %v795_v14 = vpop.permute.xlu0 %794 }
 0x16e   : > { %v849_v39 = vperm.slane %v795_v14, %v848_v27 }
 0x176   : > { %v491_v49 = vpop.xlane.xlu1 %490 }
 0x17f   : > { %v488_v32 = vpop.xlane.xlu2 %487 }
 0x180   : > { %v751_v45 = vadd.f32 %v714_v25, %v488_v32  ;;  %v864_v25 = vadd.s32 4294967200, %v1717_v3 }
 0x182   : > { %812 = vperm.xlu0 %1324, %v751_v45  }
 0x187   : > { %v720_v36 = vpop.permute.xlu2 %719 }
 0x188   : > { %v752_v52 = vadd.f32 %v720_v36, %v491_v49 }
 0x18a   : > { %815 = vperm.xlu1 %1322, %v752_v52   ;;  %534 = vperm.xlu0 %1324, %v1706_v2  }
 0x18e   : > { %v771_v63 = vpop.permute.xlu1 %770 }
 0x18f   : > { %v774_v61 = vpop.permute.xlu2 %773  ;;  %v819_v54 = vperm.slane %v771_v63, %v1717_v3 }
 0x190   : > { %v821_v1 = vperm.slane %v774_v61, %v820_v8 }
 0x192   : > { %1326 = vrot.lane.b32.xlu1 %v1325_v56, %s1391_s20  ;;  %1336 = vrot.lane.b32.xlu0 %v1335_v20, %s1391_s20  ;;  %v823_v51 = vsel %vm822_vm1, %v821_v1, %v819_v54  ;;  %vm1103_vm1 = vcmask 31768  }
 0x193   : > { %v827_v12 = vsel %vm826_vm2, %v825_v0, %v823_v51  ;;  %vm1171_vm2 = vcmask 23552  }
 0x196   : > { %v789_v15 = vpop.permute.xlu1 %788 }
 0x197   : > { %v780_v53 = vpop.permute.xlu2 %779  ;;  %v841_v10 = vperm.slane %v789_v15, %v840_v18 }
 0x198   : > { %v829_v4 = vperm.slane %v780_v53, %v828_v6 }
 0x19a   : > { %1341 = vrot.lane.b32.xlu1 %v1340_v19, %s1391_s20  ;;  %v831_v33 = vsel %vm830_vm3, %v829_v4, %v827_v12  ;;  %vm1168_vm3 = vcmask 15360  }
 0x19e   : > { %v798_v29 = vpop.permute.xlu1 %797 }
 0x19f   : > { %v783_v5 = vpop.permute.xlu2 %782  ;;  %v853_v34 = vperm.slane %v798_v29, %v852_v28 }
 0x1a0   : > { %v833_v11 = vperm.slane %v783_v5, %v832_v35 }
 0x1a1   : > { %v618_v32 = vpop.f32.mrf.mxu2 }
 0x1a2   : > { %1346 = vrot.lane.b32.xlu1 %v1345_v58, %s1391_s20  ;;  %v835_v19 = vsel %vm834_vm4, %v833_v11, %v831_v33  ;;  %vm1174_vm4 = vcmask 31744  }
 0x1a3   : > { %v839_v21 = vsel %vm838_vm5, %v837_v26, %v835_v19 }
 0x1a4   : > { %v843_v37 = vsel %vm842_vm6, %v841_v10, %v839_v21 }
 0x1a7   : > { %v792_v16 = vpop.permute.xlu2 %791 }
 0x1a8   : > { %v845_v47 = vperm.slane %v792_v16, %v844_v17 }
 0x1aa   : > { %1351 = vrot.lane.b32.xlu1 %v1350_v59, %s1391_s20  ;;  %v847_v31 = vsel %vm846_vm7, %v845_v47, %v843_v37 }
 0x1ab   : > { %v851_v46 = vsel %vm850_vm8, %v849_v39, %v847_v31 }
 0x1ac   : > { %v855_v45 = vsel %vm854_vm9, %v853_v34, %v851_v46 }
 0x1af   : > { %v801_v42 = vpop.permute.xlu2 %800 }
 0x1b0   : > { %v857_v41 = vperm.slane %v801_v42, %v856_v24 }
 0x1b2   : > { %1356 = vrot.lane.b32.xlu1 %v1355_v60, %s1391_s20  ;;  %v859_v36 = vsel %vm858_vm10, %v857_v41, %v855_v45  ;;  %v620_v60 = vpop.f32.mrf.mxu2 }
 0x1b3   : > { %v807_v48 = vpop.permute.xlu1 %806 }
 0x1b4   : > { %v865_v20 = vperm.slane %v807_v48, %v864_v25 }
 0x1b7   : > { %v810_v23 = vpop.permute.xlu2 %809 }
 0x1b8   : > { %v869_v22 = vperm.slane %v810_v23, %v868_v50 }
 0x1ba   : > { %1361 = vrot.lane.b32.xlu1 %v1360_v38, %s1391_s20  ;;  %v860_v38 = vadd.s32 4294967208, %v1717_v3 }
 0x1bb   : > { %v804_v30 = vpop.permute.xlu0 %803 }
 0x1bc   : > { %v861_v43 = vperm.slane %v804_v30, %v860_v38 }
 0x1be   : > { %v863_v52 = vsel %vm862_vm11, %v861_v43, %v859_v36 }
 0x1bf   : > { %v530_v44 = vpop.permute.xlu2 %529  ;;  %v867_v56 = vsel %vm866_vm12, %v865_v20, %v863_v52 }
 0x1c0   : > { %v871_v5 = vsel %vm870_vm13, %v869_v22, %v867_v56  ;;  %v619_v8 = vadd.f32 %v618_v32, %v530_v44 }
 0x1c7   : > { %v1332_v59 = vpop.permute.xlu2 %1331 }
 0x1c8   : > { %v1334_v16 = vunpack.i.h.bf16 %v1332_v59  ;;  %v1333_v7 = vunpack.i.l.bf16 %v1332_v59 }
 0x1ca   : > { %v989_v35 = vsel %vm975_vm0, %v1334_v16, 1.0  ;;  %v988_v1 = vsel %vm975_vm0, %v1333_v7, 1.0 }
 0x1cb   : > { %v1004_v15 = vpack.c.bf16 %v988_v1, %v988_v1  ;;  %v1005_v42 = vpack.c.bf16 %v989_v35, %v989_v35 }
 0x1cd   : > { %v1042_v21 = vunpack.c.l.b16 %v1004_v15  ;;  %v1043_v47 = vunpack.c.l.b16 %v1005_v42 }
 0x1cf   : > { %v1052_v31 = vpack.c.b16 %v1043_v47, %v1042_v21 }
 0x1f4   : > { %v813_v49 = vpop.permute.xlu0 %812 }
 0x1f5   : > { %v873_v58 = vperm.slane %v813_v49, %v872_v55 }
 0x1f7   : > { %v875_v54 = vsel %vm874_vm14, %v873_v58, %v871_v5 }
 0x1fc   : > { %v816_v61 = vpop.permute.xlu1 %815  ;;  %v535_v53 = vpop.permute.xlu0 %534 }
 0x1fd   : > { %v877_v62 = vperm.slane %v816_v61, %v876_v57  ;;  %v621_v63 = vadd.f32 %v620_v60, %v535_v53 }
 0x1ff   : > { %v879_v6 = vsel %vm878_vm15, %v877_v62, %v875_v54 }
 0x200   : > { %v1735_v9 = vadd.f32 %v879_v6, %v619_v8  ;;  %v1737_v3 = vadd.f32 %v879_v6, %v621_v63 }
 0x202   : > { %895 = vmax.xlane.f32.xlu2 %v1735_v9  ;;  %897 = vmax.xlane.f32.xlu0 %v1737_v3 }
 0x204   : > { %v1327_v51 = vpop.permute.xlu1 %1326  ;;  %v1337_v4 = vpop.permute.xlu0 %1336 }
 0x205   : > { %v1329_v0 = vunpack.i.h.bf16 %v1327_v51  ;;  %v1328_v11 = vunpack.i.l.bf16 %v1327_v51  ;;  %v1339_v13 = vunpack.i.h.bf16 %v1337_v4  ;;  %v1338_v14 = vunpack.i.l.bf16 %v1337_v4 }
 0x207   : > { %v991_v12 = vsel %vm975_vm0, %v1329_v0, 1.0  ;;  %v990_v33 = vsel %vm975_vm0, %v1328_v11, 1.0  ;;  %v987_v17 = vsel %vm975_vm0, %v1339_v13, 1.0  ;;  %v986_v18 = vsel %vm975_vm0, %v1338_v14, 1.0 }
 0x208   : > { %v1006_v19 = vpack.c.bf16 %v990_v33, %v990_v33  ;;  %v1007_v26 = vpack.c.bf16 %v991_v12, %v991_v12  ;;  %v1002_v10 = vpack.c.bf16 %v986_v18, %v986_v18  ;;  %v1003_v29 = vpack.c.bf16 %v987_v17, %v987_v17 }
 0x20a   : > { %v1044_v23 = vunpack.c.l.b16 %v1006_v19  ;;  %v1045_v27 = vunpack.c.l.b16 %v1007_v26  ;;  %v1040_v38 = vunpack.c.l.b16 %v1002_v10  ;;  %v1041_v39 = vunpack.c.l.b16 %v1003_v29 }
 0x20c   : > { %v1342_v30 = vpop.permute.xlu1 %1341  ;;  %v1053_v37 = vpack.c.b16 %v1045_v27, %v1044_v23  ;;  %v1051_v44 = vpack.c.b16 %v1041_v39, %v1040_v38 }
 0x20d   : > { %v1344_v24 = vunpack.i.h.bf16 %v1342_v30  ;;  %v1343_v28 = vunpack.i.l.bf16 %v1342_v30 }
 0x20e   : > { %1062 = vmatpush.bf16.msrb.mxu3 %v1053_v37 }
 0x20f   : > { %v985_v46 = vsel %vm975_vm0, %v1344_v24, 1.0  ;;  %v984_v41 = vsel %vm975_vm0, %v1343_v28, 1.0 }
 0x210   : > { %v1000_v34 = vpack.c.bf16 %v984_v41, %v984_v41  ;;  %v1001_v43 = vpack.c.bf16 %v985_v46, %v985_v46 }
 0x212   : > { %1063 = vmatpush.bf16.msrb.mxu3 %v1052_v31  ;;  %v1038_v25 = vunpack.c.l.b16 %v1000_v34  ;;  %v1039_v32 = vunpack.c.l.b16 %v1001_v43 }
 0x214   : > { %v1347_v45 = vpop.permute.xlu1 %1346  ;;  %v1050_v36 = vpack.c.b16 %v1039_v32, %v1038_v25 }
 0x215   : > { %v1349_v48 = vunpack.i.h.bf16 %v1347_v45  ;;  %v1348_v49 = vunpack.i.l.bf16 %v1347_v45 }
 0x216   : > { %1064 = vmatpush.bf16.msrb.mxu3 %v1051_v44 }
 0x217   : > { %v983_v50 = vsel %vm975_vm0, %v1349_v48, 1.0  ;;  %v982_v52 = vsel %vm975_vm0, %v1348_v49, 1.0 }
 0x218   : > { %v998_v55 = vpack.c.bf16 %v982_v52, %v982_v52  ;;  %v999_v20 = vpack.c.bf16 %v983_v50, %v983_v50 }
 0x21a   : > { %1065 = vmatpush.bf16.msrb.mxu3 %v1050_v36  ;;  %v1036_v56 = vunpack.c.l.b16 %v998_v55  ;;  %v1037_v57 = vunpack.c.l.b16 %v999_v20 }
 0x21c   : > { %v1352_v22 = vpop.permute.xlu1 %1351  ;;  %v1049_v58 = vpack.c.b16 %v1037_v57, %v1036_v56 }
 0x21d   : > { %v1354_v59 = vunpack.i.h.bf16 %v1352_v22  ;;  %v1353_v60 = vunpack.i.l.bf16 %v1352_v22 }
 0x21e   : > { %1066 = vmatpush.bf16.msrb.mxu3 %v1049_v58 }
 0x21f   : > { %v981_v61 = vsel %vm975_vm0, %v1354_v59, 1.0  ;;  %v980_v53 = vsel %vm975_vm0, %v1353_v60, 1.0 }
 0x220   : > { %v996_v5 = vpack.c.bf16 %v980_v53, %v980_v53  ;;  %v997_v62 = vpack.c.bf16 %v981_v61, %v981_v61 }
 0x222   : > { %v1034_v63 = vunpack.c.l.b16 %v996_v5  ;;  %v1035_v16 = vunpack.c.l.b16 %v997_v62 }
 0x224   : > { %v1357_v7 = vpop.permute.xlu1 %1356  ;;  %v1048_v8 = vpack.c.b16 %v1035_v16, %v1034_v63 }
 0x225   : > { %v1359_v54 = vunpack.i.h.bf16 %v1357_v7  ;;  %v1358_v6 = vunpack.i.l.bf16 %v1357_v7 }
 0x226   : > { %1067 = vmatpush.bf16.msrb.mxu3 %v1048_v8 }
 0x227   : > { %v979_v35 = vsel %vm975_vm0, %v1359_v54, 1.0  ;;  %v978_v1 = vsel %vm975_vm0, %v1358_v6, 1.0 }
 0x228   : > { %v994_v51 = vpack.c.bf16 %v978_v1, %v978_v1  ;;  %v995_v4 = vpack.c.bf16 %v979_v35, %v979_v35 }
 0x22a   : > { %v1032_v15 = vunpack.c.l.b16 %v994_v51  ;;  %v1033_v42 = vunpack.c.l.b16 %v995_v4 }
 0x22c   : > { %v1362_v0 = vpop.permute.xlu1 %1361  ;;  %v1047_v11 = vpack.c.b16 %v1033_v42, %v1032_v15 }
 0x22d   : > { %v1364_v13 = vunpack.i.h.bf16 %v1362_v0  ;;  %v1363_v14 = vunpack.i.l.bf16 %v1362_v0 }
 0x22e   : > { %1068 = vmatpush.bf16.msrb.mxu3 %v1047_v11 }
 0x22f   : > { %v977_v12 = vsel %vm975_vm0, %v1364_v13, 1.0  ;;  %v976_v33 = vsel %vm975_vm0, %v1363_v14, 1.0 }
 0x230   : > { %v992_v17 = vpack.c.bf16 %v976_v33, %v976_v33  ;;  %v993_v18 = vpack.c.bf16 %v977_v12, %v977_v12 }
 0x232   : > { %v1030_v19 = vunpack.c.l.b16 %v992_v17  ;;  %v1031_v26 = vunpack.c.l.b16 %v993_v18 }
 0x234   : > { %v1046_v21 = vpack.c.b16 %v1031_v26, %v1030_v19 }
 0x236   : > { %1069 = vmatpush.bf16.msrb.mxu3 %v1046_v21 }
 0x275   : > { %v896_v47 = vpop.xlane.xlu2 %895  ;;  %v898_v23 = vpop.xlane.xlu0 %897 }
 0x276   : > { %v899_v27 = vsub.f32 %v1735_v9, %v896_v47  ;;  %v900_v10 = vsub.f32 %v1737_v3, %v898_v23  ;;  %v1088_v45 = vmax.f32 %v896_v47, %v898_v23 }
 0x278   : > { %v901_v29 = vpack.c.bf16 %v899_v27, %v899_v27  ;;  %v902_v30 = vpack.c.bf16 %v900_v10, %v900_v10  ;;  %v1089_v48 = vrot.slane %v1088_v45, 4 }
 0x27a   : > { %v903_v37 = vunpack.c.l.bf16 %v901_v29  ;;  %v904_v24 = vunpack.c.l.bf16 %v902_v30  ;;  %v1090_v49 = vmax.f32 %v1088_v45, %v1089_v48 }
 0x27c   : > { %v905_v28 = vmul.f32 1.442695, %v903_v37  ;;  %v907_v31 = vmul.f32 1.442695, %v904_v24  ;;  %v1091_v36 = vrot.slane %v1090_v49, 2 }
 0x27e   : > { %1368 = vpow2.f32 %v905_v28  ;;  %v1092_v50 = vmax.f32 %v1090_v49, %v1091_v36 }
 0x27f   : > { %1370 = vpow2.f32 %v907_v31 }
 0x280   : > { %v1093_v52 = vrot.slane %v1092_v50, 1 }
 0x282   : > { %v1094_v55 = vmax.f32 %v1092_v50, %v1093_v52 }
 0x284   : > { %v1369_v38 = vpop.eup %1368  ;;  %v1095_v20 = vsub.f32 %v896_v47, %v1094_v55  ;;  %v1096_v56 = vsub.f32 %v898_v23, %v1094_v55 }
 0x285   : > { %v1371_v39 = vpop.eup %1370  ;;  %v909_v46 = vpack.c.bf16 %v1369_v38, %v1369_v38 }
 0x286   : > { %v910_v41 = vpack.c.bf16 %v1371_v39, %v1371_v39  ;;  %v1097_v57 = vmul.f32 1.442695, %v1095_v20  ;;  %v1099_v22 = vmul.f32 1.442695, %v1096_v56 }
 0x287   : > { %v1010_v34 = vunpack.c.l.b16 %v909_v46 }
 0x288   : > { %v1011_v43 = vunpack.c.l.b16 %v910_v41 }
 0x28a   : > { %v1012_v44 = vpack.c.b16 %v1011_v43, %v1010_v34 }
 0x28c   : > { %1070 = vmatmul.bf16.vlgmr.msrb.gmra.mxu3 %v1012_v44 }
 0x30f   : > { %v1071_v25 = vpop.f32.mrf.mxu3 }
 0x310   : > { %1372 = vrcp.f32 %v1071_v25 }
 0x316   : > { %v1373_v9 = vpop.eup %1372 }
 0x317   : > { %1080 = vrot.lane.b32.xlu1 %v1373_v9, %s1392_s21  ;;  %v1073_v3 = vpop.f32.mrf.mxu3 }
 0x318   : > { %1374 = vrcp.f32 %v1073_v3 }
 0x319   : > { %1376 = vpow2.f32 %v1097_v57 }
 0x31a   : > { %1378 = vpow2.f32 %v1099_v22 }
 0x31e   : > { %v1375_v32 = vpop.eup %1374 }
 0x31f   : > { %1082 = vrot.lane.b32.xlu2 %v1375_v32, %s1392_s21  ;;  %v1377_v58 = vpop.eup %1376 }
 0x320   : > { %v1379_v59 = vpop.eup %1378  ;;  %v1101_v5 = vmul.f32 %v1377_v58, %v1702_v40 }
 0x321   : > { %v1113_v60 = vadd.f32 %v1379_v59, %v1377_v58  ;;  %v1102_v61 = vmul.f32 %v1379_v59, %v1706_v2 }
 0x322   : > { %v1104_v63 = vsel %vm1103_vm1, %v1101_v5, 0.0 }
 0x323   : > { %v1114_v53 = vrot.slane %v1113_v60, 4  ;;  %v1105_v16 = vsel %vm1103_vm1, %v1102_v61, 0.0 }
 0x324   : > { %v1106_v7 = vadd.f32 %v1105_v16, %v1104_v63 }
 0x325   : > { %v1115_v62 = vadd.f32 %v1114_v53, %v1113_v60 }
 0x326   : > { %v1107_v54 = vrot.slane %v1106_v7, 4 }
 0x327   : > { %v1116_v8 = vrot.slane %v1115_v62, 2 }
 0x328   : > { %v1108_v35 = vadd.f32 %v1107_v54, %v1106_v7 }
 0x329   : > { %v1117_v6 = vadd.f32 %v1116_v8, %v1115_v62 }
 0x32a   : > { %v1109_v51 = vrot.slane %v1108_v35, 2 }
 0x32b   : > { %v1118_v1 = vrot.slane %v1117_v6, 1 }
 0x32c   : > { %v1110_v15 = vadd.f32 %v1109_v51, %v1108_v35 }
 0x32d   : > { %v1119_v4 = vadd.f32 %v1118_v1, %v1117_v6 }
 0x32e   : > { %v1111_v11 = vrot.slane %v1110_v15, 1 }
 0x32f   : > { %1380 = vrcp.f32 %v1119_v4 }
 0x330   : > { %v1112_v14 = vadd.f32 %v1111_v11, %v1110_v15 }
 0x335   : > { %v1381_v13 = vpop.eup %1380 }
 0x336   : > { %v1121_v12 = vmul.f32 %v1381_v13, %v1112_v14 }
 0x379   : > { %v1083_v42 = vpop.permute.xlu2 %1082 }
 0x37a   : > { %v1087_v0 = vmul.f32 %v1083_v42, %v1073_v3 }
 0x37c   : > { %1126 = vrot.lane.b32.xlu1 %v1087_v0, %s1393_s22 }
 0x384   : > { %1133 = vrot.lane.b32.xlu1 %v1121_v12, %s1394_s23 }
 0x389   : > { %v1081_v33 = vpop.permute.xlu1 %1080 }
 0x38a   : > { %v1086_v17 = vmul.f32 %v1081_v33, %v1071_v25 }
 0x38c   : > { %1124 = vrot.lane.b32.xlu0 %v1086_v17, %s1393_s22  ;;  %1144 = vrot.lane.b32.xlu2 %v1086_v17, %s1395_s24 }
 0x38d   : > { %1140 = vrot.lane.b32.xlu1 %v1706_v2, %s1394_s23 }
 0x394   : > { %1138 = vrot.lane.b32.xlu0 %v1702_v40, %s1394_s23 }
 0x39c   : > { %1146 = vrot.lane.b32.xlu0 %v1087_v0, %s1395_s24 }
 0x3e6   : > { %v1145_v37 = vpop.permute.xlu2 %1144 }
 0x3ee   : > { %v1127_v18 = vpop.permute.xlu1 %1126 }
 0x3ef   : > { %v1131_v19 = vmul.f32 %v1127_v18, %v1706_v2 }
 0x3f1   : > { %1154 = vrot.lane.b32.xlu2 %v1131_v19, %s1392_s21 }
 0x3f6   : > { %v1134_v26 = vpop.permute.xlu1 %1133 }
 0x3f7   : > { %v1136_v21 = vmul.f32 %v1134_v26, %v1086_v17  ;;  %v1137_v27 = vmul.f32 %v1134_v26, %v1087_v0 }
 0x3f9   : > { %1160 = vrot.lane.b32.xlu0 %v1136_v21, %s1393_s22 }
 0x3fe   : > { %v1125_v47 = vpop.permute.xlu0 %1124 }
 0x3ff   : > { %v1130_v23 = vmul.f32 %v1125_v47, %v1702_v40  ;;  %v1141_v29 = vpop.permute.xlu1 %1140 }
 0x401   : > { %1152 = vrot.lane.b32.xlu1 %v1130_v23, %s1392_s21 }
 0x406   : > { %v1139_v10 = vpop.permute.xlu0 %1138 }
 0x407   : > { %v1166_v2 = vsel %vm975_vm0, %v1139_v10, %v1145_v37 }
 0x409   : > { %1162 = vrot.lane.b32.xlu1 %v1137_v27, %s1393_s22 }
 0x40e   : > { %v1147_v30 = vpop.permute.xlu0 %1146 }
 0x40f   : > { %v1167_v39 = vsel %vm975_vm0, %v1141_v29, %v1147_v30 }
 0x44b   : > { %v1155_v38 = vpop.permute.xlu2 %1154 }
 0x44c   : > { %v1170_v46 = vsel %vm1168_vm3, %v1167_v39, %v1155_v38 }
 0x46b   : > { %v1161_v40 = vpop.permute.xlu0 %1160 }
 0x473   : > { %v1153_v24 = vpop.permute.xlu1 %1152 }
 0x474   : > { %v1169_v28 = vsel %vm1168_vm3, %v1166_v2, %v1153_v24 }
 0x475   : > { %v1172_v31 = vsel %vm1171_vm2, %v1169_v28, %v1161_v40 }
 0x476   : > { %1175 = vst.msk [vmem:[%s258_s27] sm:$0xff] %vm1174_vm4, %v1172_v31 }
 0x47b   : > { %v1163_v41 = vpop.permute.xlu1 %1162 }
 0x47c   : > { %v1173_v34 = vsel %vm1171_vm2, %v1170_v46, %v1163_v41 }
 0x47d   : > { %1176 = vst.msk [vmem:[%s258_s27 + $0x8] sm:$0xff] %vm1174_vm4, %v1173_v34 }
 0x47e PF: > { %s15_s18 = sadd.s32 1, %s1388_s18  }
 0x47f   : > { %p12_p4 = scmp.ge.s32.totalorder %s15_s18, 4  }
 0x481   :  { %14 = sbr.rel (!%p12_p4) target bundleno = 1 (0x1), region = 76 }

</bundles_post_ra>
